<compile_context>
chip_gen: v7x
topology: tpu7x:2x2x1
jax: 0.10.0
libtpu: 0.0.40
codegen_flags: <defaults>
</compile_context>

<pallas_src>
import functools

import jax
import jax.numpy as jnp
from jax import lax
from jax.experimental import pallas as pl
from jax.experimental.pallas import tpu as pltpu

LN_EPS = 1e-5   # PyTorch nn.LayerNorm default
HALO = 8        # halo rows per tile side (2 are semantically required by the two stacked
                # k=3 convs; 8 keeps every concatenated piece sublane-aligned)


def _layernorm(h, gamma, beta):
    # Single-pass statistics: sum(h) and sum(h*h) together, var = E[x^2] - mean^2.
    # f32 accumulation; variance clamped at 0 for numerical safety.
    mean = jnp.mean(h, axis=-1, keepdims=True)
    mean_sq = jnp.mean(h * h, axis=-1, keepdims=True)
    var = jnp.maximum(mean_sq - mean * mean, 0.0)
    return (h - mean) * lax.rsqrt(var + LN_EPS) * gamma + beta


def _conv3(h, w_ref, b_ref):
    """Conv1d(k=3) along rows, evaluated on every row of the block.

    y[t] = x[t-1] @ W0 + x[t] @ W1 + x[t+1] @ W2 + b
         = roll(x @ W0, +1)[t] + (x @ W1)[t] + roll(x @ W2, R-1)[t] + b

    Rolling the f32 products (instead of three shifted bf16 copies of x) means one
    f32->bf16 pack per conv and only non-negative roll shifts.  Rows 0 and R-1 of the
    result hold wrapped garbage; callers never consume them.
    """
    r = h.shape[0]
    hb = h.astype(jnp.bfloat16)                                       # single pack
    p0 = jnp.dot(hb, w_ref[0], preferred_element_type=jnp.float32)
    p1 = jnp.dot(hb, w_ref[1], preferred_element_type=jnp.float32)
    p2 = jnp.dot(hb, w_ref[2], preferred_element_type=jnp.float32)
    return (pltpu.roll(p0, shift=1, axis=0)
            + p1
            + pltpu.roll(p2, shift=r - 1, axis=0)                      # == shift -1
            + b_ref[...])


def variance_predictor_kernel(
    x_ref,             # (TILE_T, C) f32      core rows of this time tile
    halo_ref,          # (2*HALO, C) f32      rows just before / after this tile
    w1_ref, b1_ref,    # (3, C, C) bf16, (1, C) f32    conv1
    g1_ref, be1_ref,   # (1, C), (1, C) f32            layernorm 1
    w2_ref, b2_ref,    # (3, C, C) bf16, (1, C) f32    conv2
    g2_ref, be2_ref,   # (1, C), (1, C) f32            layernorm 2
    wl_ref, bl_ref,    # (1, C), (1, 1) f32            final linear (row weight)
    out_ref,           # (1, TILE_T) f32      lane-dense output row
    *, seq_len, tile_t,
):
    tt = tile_t
    t = pl.program_id(1)
    r = tt + 2 * HALO

    # Global row index of every window row; one (r, 1) mask reused at both stages.
    g = t * tt - HALO + lax.broadcasted_iota(jnp.int32, (r, 1), 0)
    valid = (g >= 0) & (g < seq_len)

    # Assemble the haloed window [before | core | after]; every piece starts at a
    # multiple-of-8 sublane offset.
    window = jnp.concatenate(
        [halo_ref[0:HALO, :], x_ref[...], halo_ref[HALO:2 * HALO, :]], axis=0)
    # Zeroing invalid rows implements conv_1's zero padding at the true sequence ends
    # and neutralises ragged-tail / clipped-halo garbage rows.
    window = jnp.where(valid, window, 0.0)

    # ---- conv_1 -> block_1 (ReLU, LayerNorm; Dropout(p=0) is a no-op) ----
    h = _conv3(window, w1_ref, b1_ref)
    h = jnp.maximum(h, 0.0)
    h = _layernorm(h, g1_ref[...], be1_ref[...])
    h = jnp.where(valid, h, 0.0)        # conv_2's zero padding at the sequence ends

    # ---- conv_2 -> block_2 ----
    h = _conv3(h, w2_ref, b2_ref)
    h = jnp.maximum(h, 0.0)
    h = _layernorm(h, g2_ref[...], be2_ref[...])

    # ---- linear (C -> 1) + ReLU: VPU multiply + lane reduction, stored lane-dense ----
    proj = jnp.sum(h * wl_ref[...], axis=-1) + bl_ref[0, 0]            # (r,)
    out_ref[...] = jnp.maximum(proj[HALO:HALO + tt], 0.0)[None, :]


def _vmem_limit_bytes():
    # Generation-aware VMEM request: ~3/4 of physical, capped at 64 MiB
    # (=> ~48 MiB on v7x's 64 MiB/TC, 64 MiB on v5e/v6e's 128 MiB).
    try:
        cap = int(pltpu.get_tpu_info().vmem_capacity_bytes)
    except Exception:  # interpret mode / no TPU visible at trace time
        cap = 128 * 1024 * 1024
    return int(min(cap * 3 // 4, 64 * 1024 * 1024))


def variance_predictor(x, params, *, tile_t=None):
    """x: (B, T, C) float32 -> (B, T) float32."""
    B, T, C = x.shape

    if tile_t is None:
        # >=256 rows fills the 256-row MXU M dim on v6e/v7x; 128 is fine on v5e.
        tile_t = 256 if T >= 256 else (128 if T >= 128 else T)
    tt = int(tile_t)
    n_t = -(-T // tt)
    t_pad = n_t * tt

    # bf16 weights for the MXU taps; all elementwise math stays f32.
    w1 = params["w1_k"].astype(jnp.bfloat16)
    w2 = params["w2_k"].astype(jnp.bfloat16)
    wl_row = jnp.transpose(params["wl"])                               # (1, C)

    # Per-tile halo rows (HALO before + HALO after each tile), gathered once on the
    # wrapper side (n_t * 2*HALO rows total — tiny).  Indices outside [0, T) are clipped
    # here and zeroed by the in-kernel validity mask.
    starts = jnp.arange(n_t, dtype=jnp.int32) * tt
    offs = jnp.concatenate([jnp.arange(-HALO, 0, dtype=jnp.int32),
                            jnp.arange(tt, tt + HALO, dtype=jnp.int32)])
    halo_idx = jnp.clip(starts[:, None] + offs[None, :], 0, T - 1)     # (n_t, 2*HALO)
    halo = jnp.take(x, halo_idx.reshape(-1), axis=1).reshape(B, n_t, 2 * HALO, C)

    def const_spec(shape):
        n = len(shape)
        return pl.BlockSpec(shape, lambda b, t, _n=n: (0,) * _n)

    in_specs = [
        pl.BlockSpec((None, tt, C), lambda b, t: (b, t, 0)),                 # x core tile
        pl.BlockSpec((None, None, 2 * HALO, C), lambda b, t: (b, t, 0, 0)),  # halo rows
        const_spec((3, C, C)), const_spec((1, C)),                           # conv1 w, b
        const_spec((1, C)), const_spec((1, C)),                              # ln1
        const_spec((3, C, C)), const_spec((1, C)),                           # conv2 w, b
        const_spec((1, C)), const_spec((1, C)),                              # ln2
        const_spec((1, C)), const_spec((1, 1)),                              # linear
    ]
    out_spec = pl.BlockSpec((None, None, 1, tt), lambda b, t: (b, t, 0, 0))

    flops = 2 * (2 * B * t_pad * 3 * C * C) + 2 * B * t_pad * C
    bytes_accessed = (B * T * C * 4 + B * n_t * 2 * HALO * C * 4
                      + B * t_pad * 4 + 2 * 3 * C * C * 2 + 8 * C * 4)

    kernel = functools.partial(variance_predictor_kernel, seq_len=T, tile_t=tt)

    out = pl.pallas_call(
        kernel,
        out_shape=jax.ShapeDtypeStruct((B, n_t, 1, tt), jnp.float32),
        grid=(B, n_t),
        in_specs=in_specs,
        out_specs=out_spec,
        compiler_params=pltpu.CompilerParams(
            dimension_semantics=("parallel", "parallel"),
            vmem_limit_bytes=_vmem_limit_bytes(),
        ),
        cost_estimate=pl.CostEstimate(
            flops=int(flops),
            transcendentals=int(2 * B * t_pad),
            bytes_accessed=int(bytes_accessed)),
    )(
        x, halo,
        w1, params["b1"], params["g1"], params["be1"],
        w2, params["b2"], params["g2"], params["be2"],
        wl_row, params["bl"],
    )
    return out.reshape(B, n_t * tt)[:, :T]


# ---------------------------- reference (pure JAX) ----------------------------

def _layernorm_ref(h, gamma, beta):
    mean = jnp.mean(h, axis=-1, keepdims=True)
    var = jnp.mean((h - mean) ** 2, axis=-1, keepdims=True)
    return (h - mean) * lax.rsqrt(var + LN_EPS) * gamma + beta


def reference_forward(x, p, *, bf16_matmul):
    """Mirror of the PyTorch module using lax.conv_general_dilated in NCW.
    With bf16_matmul=True the conv operands are cast to bf16 (same precision as the
    kernel's MXU path); accumulation / LayerNorm / final linear stay in f32."""
    cast = (lambda a: a.astype(jnp.bfloat16)) if bf16_matmul else (lambda a: a)

    def conv1d(x_btc, w_oik, b_o):
        xt = jnp.transpose(x_btc, (0, 2, 1))                           # (B, C, T)
        y = lax.conv_general_dilated(
            cast(xt), cast(w_oik), window_strides=(1,), padding=((1, 1),),
            dimension_numbers=("NCH", "OIH", "NCH"),
            preferred_element_type=jnp.float32)
        y = y + b_o[None, :, None]
        return jnp.transpose(y, (0, 2, 1))                             # (B, T, C)

    h = conv1d(x, p["conv1_w_torch"], p["b1"][0])
    h = jax.nn.relu(h)
    h = _layernorm_ref(h, p["g1"][0], p["be1"][0])
    h = conv1d(h, p["conv2_w_torch"], p["b2"][0])
    h = jax.nn.relu(h)
    h = _layernorm_ref(h, p["g2"][0], p["be2"][0])
    h = h @ p["wl"] + p["bl"][0]
    h = jax.nn.relu(h)
    return h[..., 0]


# ---------------------------------- main --------------------------------------

def make_params(key, C):
    ks = jax.random.split(key, 10)
    s = 0.1
    conv1_w = s * jax.random.normal(ks[0], (C, C, 3), jnp.float32)     # torch (O, I, K)
    conv2_w = s * jax.random.normal(ks[1], (C, C, 3), jnp.float32)
    return dict(
        conv1_w_torch=conv1_w,
        conv2_w_torch=conv2_w,
        # kernel-friendly tap-major form: (K, C_in, C_out)
        w1_k=jnp.transpose(conv1_w, (2, 1, 0)),
        w2_k=jnp.transpose(conv2_w, (2, 1, 0)),
        b1=s * jax.random.normal(ks[2], (1, C), jnp.float32),
        b2=s * jax.random.normal(ks[3], (1, C), jnp.float32),
        g1=1.0 + s * jax.random.normal(ks[4], (1, C), jnp.float32),
        be1=s * jax.random.normal(ks[5], (1, C), jnp.float32),
        g2=1.0 + s * jax.random.normal(ks[6], (1, C), jnp.float32),
        be2=s * jax.random.normal(ks[7], (1, C), jnp.float32),
        wl=s * jax.random.normal(ks[8], (C, 1), jnp.float32),
        bl=s * jax.random.normal(ks[9], (1, 1), jnp.float32),
    )


if __name__ == "__main__":
    key = jax.random.PRNGKey(0)
    k1, k2, k3, k4 = jax.random.split(key, 4)

    # Case 1: tiny shapes, single time tile (module-interface check).
    B, T, C = 2, 8, 32
    x = jax.random.normal(k1, (B, T, C), jnp.float32)
    params = make_params(k2, C)
    out = jax.block_until_ready(variance_predictor(x, params))
    assert out.shape == (B, T), out.shape

    ref_bf16 = reference_forward(x, params, bf16_matmul=True)
    assert jnp.allclose(out, ref_bf16, rtol=5e-3, atol=5e-3), (
        f"case1 max abs diff vs bf16-matmul reference: {jnp.max(jnp.abs(out - ref_bf16))}")
    ref_f32 = reference_forward(x, params, bf16_matmul=False)
    assert jnp.allclose(out, ref_f32, rtol=1e-1, atol=1e-1), (
        f"case1 max abs diff vs f32 reference: {jnp.max(jnp.abs(out - ref_f32))}")

    # Case 2: multi-tile path with a ragged last tile (exercises the halo exchange,
    # cross-tile conv correctness and the sequence-end masking).
    B2, T2, C2 = 2, 200, 128
    x2 = jax.random.normal(k3, (B2, T2, C2), jnp.float32)
    params2 = make_params(k4, C2)
    out2 = jax.block_until_ready(variance_predictor(x2, params2, tile_t=128))
    assert out2.shape == (B2, T2), out2.shape
    ref2 = reference_forward(x2, params2, bf16_matmul=True)
    assert jnp.allclose(out2, ref2, rtol=1e-2, atol=1e-2), (
        f"case2 max abs diff vs bf16-matmul reference: {jnp.max(jnp.abs(out2 - ref2))}")

    print("KERNEL_OK")
</pallas_src>

<mosaic_0001>
module attributes {stable_mosaic.version = 11 : i64} {
  func.func @variance_predictor_kernel(%arg0: i32, %arg1: i32, %arg2: memref<1x8x32xf32, #tpu.memory_space<vmem>>, %arg3: memref<1x1x16x32xf32, #tpu.memory_space<vmem>>, %arg4: memref<3x32x32xbf16, #tpu.memory_space<vmem>>, %arg5: memref<1x32xf32, #tpu.memory_space<vmem>>, %arg6: memref<1x32xf32, #tpu.memory_space<vmem>>, %arg7: memref<1x32xf32, #tpu.memory_space<vmem>>, %arg8: memref<3x32x32xbf16, #tpu.memory_space<vmem>>, %arg9: memref<1x32xf32, #tpu.memory_space<vmem>>, %arg10: memref<1x32xf32, #tpu.memory_space<vmem>>, %arg11: memref<1x32xf32, #tpu.memory_space<vmem>>, %arg12: memref<1x32xf32, #tpu.memory_space<vmem>>, %arg13: memref<1x1xf32, #tpu.memory_space<vmem>>, %arg14: memref<1x1x1x8xf32, #tpu.memory_space<vmem>>) attributes {dimension_semantics = [#tpu.dimension_semantics<parallel>, #tpu.dimension_semantics<parallel>], iteration_bounds = array<i64: 2, 1>, scalar_prefetch = 0 : i64, scratch_operands = 0 : i64, tpu.core_type = #tpu.core_type<tc>, window_params = [{transform_indices = @transform_0, window_bounds = array<i64: 1, 8, 32>}, {transform_indices = @transform_1, window_bounds = array<i64: 1, 1, 16, 32>}, {pipeline_mode = #tpu.pipeline_mode<synchronous>, transform_indices = @transform_2, window_bounds = array<i64: 3, 32, 32>}, {pipeline_mode = #tpu.pipeline_mode<synchronous>, transform_indices = @transform_3, window_bounds = array<i64: 1, 32>}, {pipeline_mode = #tpu.pipeline_mode<synchronous>, transform_indices = @transform_4, window_bounds = array<i64: 1, 32>}, {pipeline_mode = #tpu.pipeline_mode<synchronous>, transform_indices = @transform_5, window_bounds = array<i64: 1, 32>}, {pipeline_mode = #tpu.pipeline_mode<synchronous>, transform_indices = @transform_6, window_bounds = array<i64: 3, 32, 32>}, {pipeline_mode = #tpu.pipeline_mode<synchronous>, transform_indices = @transform_7, window_bounds = array<i64: 1, 32>}, {pipeline_mode = #tpu.pipeline_mode<synchronous>, transform_indices = @transform_8, window_bounds = array<i64: 1, 32>}, {pipeline_mode = #tpu.pipeline_mode<synchronous>, transform_indices = @transform_9, window_bounds = array<i64: 1, 32>}, {pipeline_mode = #tpu.pipeline_mode<synchronous>, transform_indices = @transform_10, window_bounds = array<i64: 1, 32>}, {pipeline_mode = #tpu.pipeline_mode<synchronous>, transform_indices = @transform_11, window_bounds = array<i64: 1, 1>}, {transform_indices = @transform_12, window_bounds = array<i64: 1, 1, 1, 8>}]} {
    %c8_i32 = arith.constant 8 : i32
    %0 = arith.muli %arg1, %c8_i32 : i32
    %c8_i32_0 = arith.constant 8 : i32
    %1 = arith.subi %0, %c8_i32_0 : i32
    %2 = tpu.iota {dimensions = array<i32: 0>} : vector<24x1xi32>
    %3 = vector.broadcast %1 : i32 to vector<24x1xi32>
    %4 = arith.addi %3, %2 : vector<24x1xi32>
    %c0_i32 = arith.constant 0 : i32
    %5 = vector.broadcast %c0_i32 : i32 to vector<24x1xi32>
    %6 = arith.cmpi sge, %4, %5 : vector<24x1xi32>
    %c8_i32_1 = arith.constant 8 : i32
    %7 = vector.broadcast %c8_i32_1 : i32 to vector<24x1xi32>
    %8 = arith.cmpi slt, %4, %7 : vector<24x1xi32>
    %9 = arith.andi %6, %8 : vector<24x1xi1>
    %c0 = arith.constant 0 : index
    %c0_2 = arith.constant 0 : index
    %c0_3 = arith.constant 0 : index
    %c0_4 = arith.constant 0 : index
    %10 = vector.load %arg3[%c0, %c0_2, %c0_3, %c0_4] : memref<1x1x16x32xf32, #tpu.memory_space<vmem>>, vector<1x1x8x32xf32>
    %11 = vector.shape_cast %10 : vector<1x1x8x32xf32> to vector<8x32xf32>
    %c0_5 = arith.constant 0 : index
    %c0_6 = arith.constant 0 : index
    %c0_7 = arith.constant 0 : index
    %12 = vector.load %arg2[%c0_5, %c0_6, %c0_7] : memref<1x8x32xf32, #tpu.memory_space<vmem>>, vector<1x8x32xf32>
    %13 = vector.shape_cast %12 : vector<1x8x32xf32> to vector<8x32xf32>
    %c0_8 = arith.constant 0 : index
    %c0_9 = arith.constant 0 : index
    %c8 = arith.constant 8 : index
    %c0_10 = arith.constant 0 : index
    %14 = vector.load %arg3[%c0_8, %c0_9, %c8, %c0_10] : memref<1x1x16x32xf32, #tpu.memory_space<vmem>>, vector<1x1x8x32xf32>
    %15 = vector.shape_cast %14 : vector<1x1x8x32xf32> to vector<8x32xf32>
    %16 = tpu.concatenate %11, %13, %15 in 0 : vector<8x32xf32>, vector<8x32xf32>, vector<8x32xf32> -> vector<24x32xf32>
    %cst = arith.constant 0.000000e+00 : f32
    %17 = vector.shape_cast %9 : vector<24x1xi1> to vector<24x1xi1>
    %18 = vector.broadcast %17 : vector<24x1xi1> to vector<24x32xi1>
    %19 = vector.broadcast %cst : f32 to vector<24x32xf32>
    %20 = arith.select %18, %16, %19 : vector<24x32xi1>, vector<24x32xf32>
    %21 = arith.truncf %20 : vector<24x32xf32> to vector<24x32xbf16>
    %c0_11 = arith.constant 0 : index
    %c0_12 = arith.constant 0 : index
    %c0_13 = arith.constant 0 : index
    %22 = vector.load %arg4[%c0_11, %c0_12, %c0_13] : memref<3x32x32xbf16, #tpu.memory_space<vmem>>, vector<1x32x32xbf16>
    %23 = vector.shape_cast %22 : vector<1x32x32xbf16> to vector<32x32xbf16>
    %cst_14 = arith.constant dense<0.000000e+00> : vector<24x32xf32>
    %24 = tpu.matmul %21, %23, %cst_14 {dimension_numbers = #tpu.dot_dimension_numbers<[1], [0], [0], [1], [0, 0, 1, 1], [], []>} : vector<24x32xbf16>, vector<32x32xbf16>, vector<24x32xf32> -> vector<24x32xf32>
    %c1 = arith.constant 1 : index
    %c0_15 = arith.constant 0 : index
    %c0_16 = arith.constant 0 : index
    %25 = vector.load %arg4[%c1, %c0_15, %c0_16] : memref<3x32x32xbf16, #tpu.memory_space<vmem>>, vector<1x32x32xbf16>
    %26 = vector.shape_cast %25 : vector<1x32x32xbf16> to vector<32x32xbf16>
    %cst_17 = arith.constant dense<0.000000e+00> : vector<24x32xf32>
    %27 = tpu.matmul %21, %26, %cst_17 {dimension_numbers = #tpu.dot_dimension_numbers<[1], [0], [0], [1], [0, 0, 1, 1], [], []>} : vector<24x32xbf16>, vector<32x32xbf16>, vector<24x32xf32> -> vector<24x32xf32>
    %c2 = arith.constant 2 : index
    %c0_18 = arith.constant 0 : index
    %c0_19 = arith.constant 0 : index
    %28 = vector.load %arg4[%c2, %c0_18, %c0_19] : memref<3x32x32xbf16, #tpu.memory_space<vmem>>, vector<1x32x32xbf16>
    %29 = vector.shape_cast %28 : vector<1x32x32xbf16> to vector<32x32xbf16>
    %cst_20 = arith.constant dense<0.000000e+00> : vector<24x32xf32>
    %30 = tpu.matmul %21, %29, %cst_20 {dimension_numbers = #tpu.dot_dimension_numbers<[1], [0], [0], [1], [0, 0, 1, 1], [], []>} : vector<24x32xbf16>, vector<32x32xbf16>, vector<24x32xf32> -> vector<24x32xf32>
    %c1_i32 = arith.constant 1 : i32
    %31 = tpu.dynamic_rotate %24 by %c1_i32 dim 0 : vector<24x32xf32>, i32 -> vector<24x32xf32>
    %32 = arith.addf %31, %27 : vector<24x32xf32>
    %c23_i32 = arith.constant 23 : i32
    %33 = tpu.dynamic_rotate %30 by %c23_i32 dim 0 : vector<24x32xf32>, i32 -> vector<24x32xf32>
    %34 = arith.addf %32, %33 : vector<24x32xf32>
    %c0_21 = arith.constant 0 : index
    %c0_22 = arith.constant 0 : index
    %35 = vector.load %arg5[%c0_21, %c0_22] : memref<1x32xf32, #tpu.memory_space<vmem>>, vector<1x32xf32>
    %36 = vector.broadcast %35 : vector<1x32xf32> to vector<24x32xf32>
    %37 = arith.addf %34, %36 : vector<24x32xf32>
    %cst_23 = arith.constant 0.000000e+00 : f32
    %38 = vector.broadcast %cst_23 : f32 to vector<24x32xf32>
    %39 = arith.maximumf %37, %38 : vector<24x32xf32>
    %c0_24 = arith.constant 0 : index
    %c0_25 = arith.constant 0 : index
    %40 = vector.load %arg6[%c0_24, %c0_25] : memref<1x32xf32, #tpu.memory_space<vmem>>, vector<1x32xf32>
    %c0_26 = arith.constant 0 : index
    %c0_27 = arith.constant 0 : index
    %41 = vector.load %arg7[%c0_26, %c0_27] : memref<1x32xf32, #tpu.memory_space<vmem>>, vector<1x32xf32>
    %cst_28 = arith.constant dense<0.000000e+00> : vector<24xf32>
    %42 = vector.multi_reduction <add>, %39, %cst_28 [1] : vector<24x32xf32> to vector<24xf32>
    %43 = vector.shape_cast %42 : vector<24xf32> to vector<24x1xf32>
    %cst_29 = arith.constant 3.200000e+01 : f32
    %44 = vector.broadcast %cst_29 : f32 to vector<24x1xf32>
    %45 = arith.divf %43, %44 : vector<24x1xf32>
    %46 = arith.mulf %39, %39 : vector<24x32xf32>
    %cst_30 = arith.constant dense<0.000000e+00> : vector<24xf32>
    %47 = vector.multi_reduction <add>, %46, %cst_30 [1] : vector<24x32xf32> to vector<24xf32>
    %48 = vector.shape_cast %47 : vector<24xf32> to vector<24x1xf32>
    %cst_31 = arith.constant 3.200000e+01 : f32
    %49 = vector.broadcast %cst_31 : f32 to vector<24x1xf32>
    %50 = arith.divf %48, %49 : vector<24x1xf32>
    %51 = arith.mulf %45, %45 : vector<24x1xf32>
    %52 = arith.subf %50, %51 : vector<24x1xf32>
    %cst_32 = arith.constant 0.000000e+00 : f32
    %53 = vector.broadcast %cst_32 : f32 to vector<24x1xf32>
    %54 = arith.maximumf %52, %53 : vector<24x1xf32>
    %55 = vector.broadcast %45 : vector<24x1xf32> to vector<24x32xf32>
    %56 = arith.subf %39, %55 : vector<24x32xf32>
    %cst_33 = arith.constant 9.99999974E-6 : f32
    %57 = vector.broadcast %cst_33 : f32 to vector<24x1xf32>
    %58 = arith.addf %54, %57 : vector<24x1xf32>
    %59 = math.rsqrt %58 : vector<24x1xf32>
    %60 = vector.broadcast %59 : vector<24x1xf32> to vector<24x32xf32>
    %61 = arith.mulf %56, %60 : vector<24x32xf32>
    %62 = vector.broadcast %40 : vector<1x32xf32> to vector<24x32xf32>
    %63 = arith.mulf %61, %62 : vector<24x32xf32>
    %64 = vector.broadcast %41 : vector<1x32xf32> to vector<24x32xf32>
    %65 = arith.addf %63, %64 : vector<24x32xf32>
    %cst_34 = arith.constant 0.000000e+00 : f32
    %66 = vector.shape_cast %9 : vector<24x1xi1> to vector<24x1xi1>
    %67 = vector.broadcast %66 : vector<24x1xi1> to vector<24x32xi1>
    %68 = vector.broadcast %cst_34 : f32 to vector<24x32xf32>
    %69 = arith.select %67, %65, %68 : vector<24x32xi1>, vector<24x32xf32>
    %70 = arith.truncf %69 : vector<24x32xf32> to vector<24x32xbf16>
    %c0_35 = arith.constant 0 : index
    %c0_36 = arith.constant 0 : index
    %c0_37 = arith.constant 0 : index
    %71 = vector.load %arg8[%c0_35, %c0_36, %c0_37] : memref<3x32x32xbf16, #tpu.memory_space<vmem>>, vector<1x32x32xbf16>
    %72 = vector.shape_cast %71 : vector<1x32x32xbf16> to vector<32x32xbf16>
    %cst_38 = arith.constant dense<0.000000e+00> : vector<24x32xf32>
    %73 = tpu.matmul %70, %72, %cst_38 {dimension_numbers = #tpu.dot_dimension_numbers<[1], [0], [0], [1], [0, 0, 1, 1], [], []>} : vector<24x32xbf16>, vector<32x32xbf16>, vector<24x32xf32> -> vector<24x32xf32>
    %c1_39 = arith.constant 1 : index
    %c0_40 = arith.constant 0 : index
    %c0_41 = arith.constant 0 : index
    %74 = vector.load %arg8[%c1_39, %c0_40, %c0_41] : memref<3x32x32xbf16, #tpu.memory_space<vmem>>, vector<1x32x32xbf16>
    %75 = vector.shape_cast %74 : vector<1x32x32xbf16> to vector<32x32xbf16>
    %cst_42 = arith.constant dense<0.000000e+00> : vector<24x32xf32>
    %76 = tpu.matmul %70, %75, %cst_42 {dimension_numbers = #tpu.dot_dimension_numbers<[1], [0], [0], [1], [0, 0, 1, 1], [], []>} : vector<24x32xbf16>, vector<32x32xbf16>, vector<24x32xf32> -> vector<24x32xf32>
    %c2_43 = arith.constant 2 : index
    %c0_44 = arith.constant 0 : index
    %c0_45 = arith.constant 0 : index
    %77 = vector.load %arg8[%c2_43, %c0_44, %c0_45] : memref<3x32x32xbf16, #tpu.memory_space<vmem>>, vector<1x32x32xbf16>
    %78 = vector.shape_cast %77 : vector<1x32x32xbf16> to vector<32x32xbf16>
    %cst_46 = arith.constant dense<0.000000e+00> : vector<24x32xf32>
    %79 = tpu.matmul %70, %78, %cst_46 {dimension_numbers = #tpu.dot_dimension_numbers<[1], [0], [0], [1], [0, 0, 1, 1], [], []>} : vector<24x32xbf16>, vector<32x32xbf16>, vector<24x32xf32> -> vector<24x32xf32>
    %c1_i32_47 = arith.constant 1 : i32
    %80 = tpu.dynamic_rotate %73 by %c1_i32_47 dim 0 : vector<24x32xf32>, i32 -> vector<24x32xf32>
    %81 = arith.addf %80, %76 : vector<24x32xf32>
    %c23_i32_48 = arith.constant 23 : i32
    %82 = tpu.dynamic_rotate %79 by %c23_i32_48 dim 0 : vector<24x32xf32>, i32 -> vector<24x32xf32>
    %83 = arith.addf %81, %82 : vector<24x32xf32>
    %c0_49 = arith.constant 0 : index
    %c0_50 = arith.constant 0 : index
    %84 = vector.load %arg9[%c0_49, %c0_50] : memref<1x32xf32, #tpu.memory_space<vmem>>, vector<1x32xf32>
    %85 = vector.broadcast %84 : vector<1x32xf32> to vector<24x32xf32>
    %86 = arith.addf %83, %85 : vector<24x32xf32>
    %cst_51 = arith.constant 0.000000e+00 : f32
    %87 = vector.broadcast %cst_51 : f32 to vector<24x32xf32>
    %88 = arith.maximumf %86, %87 : vector<24x32xf32>
    %c0_52 = arith.constant 0 : index
    %c0_53 = arith.constant 0 : index
    %89 = vector.load %arg10[%c0_52, %c0_53] : memref<1x32xf32, #tpu.memory_space<vmem>>, vector<1x32xf32>
    %c0_54 = arith.constant 0 : index
    %c0_55 = arith.constant 0 : index
    %90 = vector.load %arg11[%c0_54, %c0_55] : memref<1x32xf32, #tpu.memory_space<vmem>>, vector<1x32xf32>
    %cst_56 = arith.constant dense<0.000000e+00> : vector<24xf32>
    %91 = vector.multi_reduction <add>, %88, %cst_56 [1] : vector<24x32xf32> to vector<24xf32>
    %92 = vector.shape_cast %91 : vector<24xf32> to vector<24x1xf32>
    %cst_57 = arith.constant 3.200000e+01 : f32
    %93 = vector.broadcast %cst_57 : f32 to vector<24x1xf32>
    %94 = arith.divf %92, %93 : vector<24x1xf32>
    %95 = arith.mulf %88, %88 : vector<24x32xf32>
    %cst_58 = arith.constant dense<0.000000e+00> : vector<24xf32>
    %96 = vector.multi_reduction <add>, %95, %cst_58 [1] : vector<24x32xf32> to vector<24xf32>
    %97 = vector.shape_cast %96 : vector<24xf32> to vector<24x1xf32>
    %cst_59 = arith.constant 3.200000e+01 : f32
    %98 = vector.broadcast %cst_59 : f32 to vector<24x1xf32>
    %99 = arith.divf %97, %98 : vector<24x1xf32>
    %100 = arith.mulf %94, %94 : vector<24x1xf32>
    %101 = arith.subf %99, %100 : vector<24x1xf32>
    %cst_60 = arith.constant 0.000000e+00 : f32
    %102 = vector.broadcast %cst_60 : f32 to vector<24x1xf32>
    %103 = arith.maximumf %101, %102 : vector<24x1xf32>
    %104 = vector.broadcast %94 : vector<24x1xf32> to vector<24x32xf32>
    %105 = arith.subf %88, %104 : vector<24x32xf32>
    %cst_61 = arith.constant 9.99999974E-6 : f32
    %106 = vector.broadcast %cst_61 : f32 to vector<24x1xf32>
    %107 = arith.addf %103, %106 : vector<24x1xf32>
    %108 = math.rsqrt %107 : vector<24x1xf32>
    %109 = vector.broadcast %108 : vector<24x1xf32> to vector<24x32xf32>
    %110 = arith.mulf %105, %109 : vector<24x32xf32>
    %111 = vector.broadcast %89 : vector<1x32xf32> to vector<24x32xf32>
    %112 = arith.mulf %110, %111 : vector<24x32xf32>
    %113 = vector.broadcast %90 : vector<1x32xf32> to vector<24x32xf32>
    %114 = arith.addf %112, %113 : vector<24x32xf32>
    %c0_62 = arith.constant 0 : index
    %c0_63 = arith.constant 0 : index
    %115 = vector.load %arg12[%c0_62, %c0_63] : memref<1x32xf32, #tpu.memory_space<vmem>>, vector<1x32xf32>
    %116 = vector.broadcast %115 : vector<1x32xf32> to vector<24x32xf32>
    %117 = arith.mulf %114, %116 : vector<24x32xf32>
    %cst_64 = arith.constant dense<0.000000e+00> : vector<24xf32>
    %118 = vector.multi_reduction <add>, %117, %cst_64 [1] : vector<24x32xf32> to vector<24xf32>
    %c0_65 = arith.constant 0 : index
    %c0_66 = arith.constant 0 : index
    %119 = vector.load %arg13[%c0_65, %c0_66] : memref<1x1xf32, #tpu.memory_space<vmem>>, vector<1x1xf32>
    %120 = vector.extract %119[0, 0] : f32 from vector<1x1xf32>
    %121 = vector.broadcast %120 : f32 to vector<24xf32>
    %122 = arith.addf %118, %121 : vector<24xf32>
    %123 = vector.extract_strided_slice %122 {offsets = [8], sizes = [8], strides = [1]} : vector<24xf32> to vector<8xf32>
    %cst_67 = arith.constant 0.000000e+00 : f32
    %124 = vector.broadcast %cst_67 : f32 to vector<8xf32>
    %125 = arith.maximumf %123, %124 : vector<8xf32>
    %126 = vector.shape_cast %125 : vector<8xf32> to vector<1x8xf32>
    %c0_68 = arith.constant 0 : index
    %c0_69 = arith.constant 0 : index
    %c0_70 = arith.constant 0 : index
    %c0_71 = arith.constant 0 : index
    %127 = vector.load %arg14[%c0_68, %c0_69, %c0_70, %c0_71] : memref<1x1x1x8xf32, #tpu.memory_space<vmem>>, vector<1x1x1x8xf32>
    %128 = vector.shape_cast %127 : vector<1x1x1x8xf32> to vector<1x8xf32>
    %129 = vector.shape_cast %126 : vector<1x8xf32> to vector<1x1x1x8xf32>
    tpu.vector_store %arg14[%c0_68, %c0_69, %c0_70, %c0_71], %129 {strides = array<i32>} : memref<1x1x1x8xf32, #tpu.memory_space<vmem>>, vector<1x1x1x8xf32>,
    return
  }
  func.func @transform_0(%arg0: i32, %arg1: i32) -> (i32, i32, i32) {
    %c0_i32 = arith.constant 0 : i32
    %c0_i32_0 = arith.constant 0 : i32
    return %arg0, %arg1, %c0_i32 : i32, i32, i32
  }
  func.func @transform_1(%arg0: i32, %arg1: i32) -> (i32, i32, i32, i32) {
    %c0_i32 = arith.constant 0 : i32
    %c0_i32_0 = arith.constant 0 : i32
    %c0_i32_1 = arith.constant 0 : i32
    return %arg0, %arg1, %c0_i32, %c0_i32_0 : i32, i32, i32, i32
  }
  func.func @transform_2(%arg0: i32, %arg1: i32) -> (i32, i32, i32) {
    %c0_i32 = arith.constant 0 : i32
    %c0_i32_0 = arith.constant 0 : i32
    %c0_i32_1 = arith.constant 0 : i32
    %c0_i32_2 = arith.constant 0 : i32
    return %c0_i32, %c0_i32_0, %c0_i32_1 : i32, i32, i32
  }
  func.func @transform_3(%arg0: i32, %arg1: i32) -> (i32, i32) {
    %c0_i32 = arith.constant 0 : i32
    %c0_i32_0 = arith.constant 0 : i32
    %c0_i32_1 = arith.constant 0 : i32
    return %c0_i32, %c0_i32_0 : i32, i32
  }
  func.func @transform_4(%arg0: i32, %arg1: i32) -> (i32, i32) {
    %c0_i32 = arith.constant 0 : i32
    %c0_i32_0 = arith.constant 0 : i32
    %c0_i32_1 = arith.constant 0 : i32
    return %c0_i32, %c0_i32_0 : i32, i32
  }
  func.func @transform_5(%arg0: i32, %arg1: i32) -> (i32, i32) {
    %c0_i32 = arith.constant 0 : i32
    %c0_i32_0 = arith.constant 0 : i32
    %c0_i32_1 = arith.constant 0 : i32
    return %c0_i32, %c0_i32_0 : i32, i32
  }
  func.func @transform_6(%arg0: i32, %arg1: i32) -> (i32, i32, i32) {
    %c0_i32 = arith.constant 0 : i32
    %c0_i32_0 = arith.constant 0 : i32
    %c0_i32_1 = arith.constant 0 : i32
    %c0_i32_2 = arith.constant 0 : i32
    return %c0_i32, %c0_i32_0, %c0_i32_1 : i32, i32, i32
  }
  func.func @transform_7(%arg0: i32, %arg1: i32) -> (i32, i32) {
    %c0_i32 = arith.constant 0 : i32
    %c0_i32_0 = arith.constant 0 : i32
    %c0_i32_1 = arith.constant 0 : i32
    return %c0_i32, %c0_i32_0 : i32, i32
  }
  func.func @transform_8(%arg0: i32, %arg1: i32) -> (i32, i32) {
    %c0_i32 = arith.constant 0 : i32
    %c0_i32_0 = arith.constant 0 : i32
    %c0_i32_1 = arith.constant 0 : i32
    return %c0_i32, %c0_i32_0 : i32, i32
  }
  func.func @transform_9(%arg0: i32, %arg1: i32) -> (i32, i32) {
    %c0_i32 = arith.constant 0 : i32
    %c0_i32_0 = arith.constant 0 : i32
    %c0_i32_1 = arith.constant 0 : i32
    return %c0_i32, %c0_i32_0 : i32, i32
  }
  func.func @transform_10(%arg0: i32, %arg1: i32) -> (i32, i32) {
    %c0_i32 = arith.constant 0 : i32
    %c0_i32_0 = arith.constant 0 : i32
    %c0_i32_1 = arith.constant 0 : i32
    return %c0_i32, %c0_i32_0 : i32, i32
  }
  func.func @transform_11(%arg0: i32, %arg1: i32) -> (i32, i32) {
    %c0_i32 = arith.constant 0 : i32
    %c0_i32_0 = arith.constant 0 : i32
    %c0_i32_1 = arith.constant 0 : i32
    return %c0_i32, %c0_i32_0 : i32, i32
  }
  func.func @transform_12(%arg0: i32, %arg1: i32) -> (i32, i32, i32, i32) {
    %c0_i32 = arith.constant 0 : i32
    %c0_i32_0 = arith.constant 0 : i32
    %c0_i32_1 = arith.constant 0 : i32
    return %arg0, %arg1, %c0_i32, %c0_i32_0 : i32, i32, i32, i32
  }
}

</mosaic_0001>

<bundles_post_ra>
// kernel: tpu_custom_call.1
= control target key start
LH: loop header
LB: loop body
LE: loop exit
PB: predicated region body
PF: predicated region fallthrough
CT: control target
= control target key end

     0   :  { %s2724_s0 = inlined_call_operand.hbm [shape: f32[2,8,32], index: 0, kind: input, shape index: {}]   ;;  %s2725_s1 = inlined_call_operand.hbm [shape: f32[2,1,16,32], index: 1, kind: input, shape index: {}]   ;;  %s2726_s2 = inlined_call_operand.hbm [shape: bf16[3,32,32], index: 2, kind: input, shape index: {}]   ;;  %s2727_s3 = inlined_call_operand.hbm [shape: f32[1,32], index: 3, kind: input, shape index: {}]   ;;  %s2728_s4 = inlined_call_operand.hbm [shape: f32[1,32], index: 4, kind: input, shape index: {}]   ;;  %s2729_s5 = inlined_call_operand.hbm [shape: f32[1,32], index: 5, kind: input, shape index: {}]   ;;  %s2730_s6 = inlined_call_operand.hbm [shape: bf16[3,32,32], index: 6, kind: input, shape index: {}]   ;;  %s2731_s7 = inlined_call_operand.hbm [shape: f32[1,32], index: 7, kind: input, shape index: {}]   ;;  %s2732_s8 = inlined_call_operand.hbm [shape: f32[1,32], index: 8, kind: input, shape index: {}]   ;;  %s2733_s9 = inlined_call_operand.hbm [shape: f32[1,32], index: 9, kind: input, shape index: {}]   ;;  %s2734_s10 = inlined_call_operand.hbm [shape: f32[1,32], index: 10, kind: input, shape index: {}]   ;;  %s2735_s11 = inlined_call_operand.<no memory space> [shape: f32[1,1], index: 11, kind: input, shape index: {}]   ;;  %s2736_s12 = inlined_call_operand.hbm [shape: f32[2,1,1,8], index: 12, kind: output, shape index: {}]  }
   0x1   :  { %2745 = sst [smem:[#allocation32_spill]] %s2724_s0  ;;  %v17_v0 = vstv %s2735_s11 }
   0x2   :  { %2746 = sst [smem:[#allocation33_spill]] %s2725_s1  ;;  %18 = vst [vmem:[#allocation2] sm:$0x1] %v17_v0 }
   0x3   :  { %2747 = sst [smem:[#allocation34_spill]] %s2726_s2 }
   0x4   :  { %2748 = sst [smem:[#allocation35_spill]] %s2727_s3 }
   0x5   :  { %2749 = sst [smem:[#allocation36_spill]] %s2728_s4 }
   0x6   :  { %2750 = sst [smem:[#allocation37_spill]] %s2729_s5 }
   0x7   :  { %2751 = sst [smem:[#allocation38_spill]] %s2730_s6 }
   0x8   :  { %2752 = sst [smem:[#allocation39_spill]] %s2731_s7 }
   0x9   :  { %2753 = sst [smem:[#allocation40_spill]] %s2736_s12 }
   0xa   :  { %19 = vsyncpa [#allocation4], 0 }
   0xb   :  { %21 = vsyncpa [#allocation4 + $0x1], 0 }
   0xc   :  { %22 = vsyncpa [#allocation7], 0 }
   0xd   :  { %24 = vsyncpa [#allocation7 + $0x1], 0 }
   0xe   :  { %25 = vsyncpa [#allocation10], 0 }
   0xf   :  { %26 = vsyncpa [#allocation13], 0 }
  0x10   :  { %27 = vsyncpa [#allocation16], 0 }
  0x11   :  { %28 = vsyncpa [#allocation19], 0 }
  0x12   :  { %29 = vsyncpa [#allocation5], 0 }
  0x13   :  { %31 = vsyncpa [#allocation5 + $0x1], 0  ;;  %s2240_s23 = smov 0   ;;  %s2242_s24 = smov 0  }
  0x14   :  { %s2244_s25 = smov 0   ;;  %s2246_s26 = smov 0  }
  0x15   :  { %s2248_s11 = smov 0   ;;  %s2250_s27 = smov 0  }
  0x16 LB: > { %2754 = sst [smem:[#allocation30_spill]] %s2144_s26  ;;  %s2271_s28 = sadd.s32 4294967295, %s2152_s27   ;;  %s2152_s27 = sphi %s2250_s27, %s37_s27   ;;  %s2148_s11 = sphi %s2248_s11, %s2796_s11   ;;  %s2144_s26 = sphi %s2246_s26, %s2795_s26   ;;  %s2140_s25 = sphi %s2244_s25, %s2794_s25   ;;  %s2136_s24 = sphi %s2242_s24, %s2793_s24   ;;  %s2132_s23 = sphi %s2240_s23, %s2792_s23  }
  0x17   : > { %p1423_p0 = scmp.ge.s32.totalorder %s2152_s27, 1  ;;  %p2741_p1 = scmp.eq.s32.totalorder %s2271_s28, 0 }
  0x18   : > { %p348_p2 = scmp.lt.s32.totalorder %s2152_s27, 3  ;;  %s2154_s30 = smov [#allocation8]  }
  0x19   : > { %s360_s13 = sshll.u32 %s2154_s30, 4  ;;  %s2155_s15 = smov [#allocation9]   ;;  %s2280_s13 = int_to_ptr.vmem [resolvable:$true] %s360_s13 }
  0x1a   : > { %p2276_p3 = pnand %p1423_p0, %p348_p2  ;;  %s374_s16 = sshll.u32 %s2155_s15, 4  ;;  %s2291_s16 = int_to_ptr.vmem [resolvable:$true] %s374_s16 }
  0x1b   : > { %s2156_s17 = smov [#allocation12]   ;;  %s2758_s2 = sld [smem:[#allocation34_spill]] }
  0x1c   : > { %s2755_s29 = scalar_select %p2276_p3, 1, 0 }
  0x1d   : > { %p1596_p4 = pneg %p2276_p3  ;;  %s2293_s18 = sshll.u32 %s2156_s17, 4  ;;  %s397_s18 = int_to_ptr.vmem [resolvable:$true] %s2293_s18 }
  0x1e   : > { %2756 = sst [smem:[#allocation31_spill]] %s2755_s29 }
  0x1f   : > { %p2287_p6 = pnand %p1596_p4, %p2741_p1 }
  0x21   : > { %s1734_s21 = scalar_lea.hbm %s2758_s2, 768  ;;  %p2303_p8 = pneg %p2287_p6 }
  0x22   : > { %p1735_p7 = scmp.ne.s32.totalorder %s2758_s2, %s1734_s21  ;;  %p1741_p11 = scmp.lt.u32.totalorder %s1734_s21, %s2758_s2 }
  0x24   : > { %p1737_p9 = pnand %p2303_p8, %p1735_p7 }
  0x26   : > { %p1738_p10 = pneg %p1737_p9 }
  0x28   : > { %p1743_p12 = pnand %p1741_p11, %p1738_p10 }
  0x2a   : > { %1746 = shalt.err (!%p1743_p12)
}
  0x2b   : > { %s1747_s19 = scalar_lea.vmem %s2280_s13, 768  ;;  %p1755_p4 = scmp.lt.s32.totalorder %s2280_s13, %s2280_s13 }
  0x2c   : > { %p1748_p13 = scmp.ne.s32.totalorder %s2280_s13, %s1747_s19  ;;  %p1756_p5 = scmp.lt.s32.totalorder %s1747_s19, %s1747_s19 }
  0x2e   : > { %p1750_p0 = pnand %p1748_p13, %p2303_p8  ;;  %p1757_p7 = por %p1756_p5, %p1755_p4 }
  0x30   : > { %p1751_p2 = pneg %p1750_p0 }
  0x32   : > { %p1758_p9 = pnand %p1757_p7, %p1751_p2 }
  0x34   : > { %1761 = shalt.err (!%p1758_p9)
}
  0x35   : > { %s2743_s20 = smov 64   ;;  %s2158_s21 = smov 4  }
  0x36   : > { %1599 = dma.hbm_to_vmem [thread:$0]  (!%p2287_p6), %s2758_s2, 768, %s2280_s13, [#allocation7], %s2743_s20, %s2743_s20, %s2158_s21  }
  0x37   : > { %s2760_s3 = sld [smem:[#allocation35_spill]] }
  0x3d   : > { %s1762_s19 = scalar_lea.hbm %s2760_s3, 16 }
  0x3e   : > { %p1763_p5 = scmp.ne.s32.totalorder %s2760_s3, %s1762_s19  ;;  %p1769_p12 = scmp.lt.u32.totalorder %s1762_s19, %s2760_s3 }
  0x40   : > { %p1765_p10 = pnand %p1763_p5, %p2303_p8 }
  0x42   : > { %p1766_p11 = pneg %p1765_p10 }
  0x44   : > { %p1771_p13 = pnand %p1769_p12, %p1766_p11 }
  0x46   : > { %1774 = shalt.err (!%p1771_p13)
}
  0x47   : > { %s1775_s13 = scalar_lea.vmem %s2291_s16, 16  ;;  %s1782_s26 = scalar_lea.vmem %s2291_s16, 32 }
  0x48   : > { %p1776_p0 = scmp.ne.s32.totalorder %s2291_s16, %s1775_s13  ;;  %p1783_p7 = scmp.lt.s32.totalorder %s2291_s16, %s2291_s16 }
  0x49   : > { %p1784_p9 = scmp.lt.s32.totalorder %s1782_s26, %s1775_s13 }
  0x4a   : > { %p1778_p2 = pnand %p1776_p0, %p2303_p8 }
  0x4b   : > { %p1785_p5 = por %p1784_p9, %p1783_p7 }
  0x4c   : > { %p1779_p4 = pneg %p1778_p2 }
  0x4e   : > { %p1786_p10 = pnand %p1785_p5, %p1779_p4 }
  0x50   : > { %1789 = shalt.err (!%p1786_p10)
}
  0x51   : > { %1602 = dma.hbm_to_vmem [thread:$0]  (!%p2287_p6), %s2760_s3, 16, %s2291_s16, [#allocation10]  }
  0x52   : > { %s2761_s5 = sld [smem:[#allocation37_spill]] }
  0x58   : > { %s1790_s30 = scalar_lea.hbm %s2761_s5, 16 }
  0x59   : > { %p1791_p11 = scmp.ne.s32.totalorder %s2761_s5, %s1790_s30  ;;  %p1797_p0 = scmp.lt.u32.totalorder %s1790_s30, %s2761_s5 }
  0x5b   : > { %p1793_p12 = pnand %p1791_p11, %p2303_p8 }
  0x5d   : > { %p1794_p13 = pneg %p1793_p12 }
  0x5f   : > { %p1799_p2 = pnand %p1797_p0, %p1794_p13 }
  0x61   : > { %1802 = shalt.err (!%p1799_p2)
}
  0x62   : > { %s1803_s26 = scalar_lea.vmem %s397_s18, 16  ;;  %s1810_s16 = scalar_lea.vmem %s397_s18, 32 }
  0x63   : > { %p1804_p4 = scmp.ne.s32.totalorder %s397_s18, %s1803_s26  ;;  %p1811_p5 = scmp.lt.s32.totalorder %s397_s18, %s397_s18 }
  0x64   : > { %p1812_p10 = scmp.lt.s32.totalorder %s1810_s16, %s1803_s26 }
  0x65   : > { %p1806_p7 = pnand %p1804_p4, %p2303_p8 }
  0x66   : > { %p1813_p1 = por %p1812_p10, %p1811_p5 }
  0x67   : > { %p1807_p9 = pneg %p1806_p7 }
  0x69   : > { %p1814_p3 = pnand %p1813_p1, %p1807_p9 }
  0x6b   : > { %1817 = shalt.err (!%p1814_p3)
}
  0x6c   : > { %1608 = dma.hbm_to_vmem [thread:$0]  (!%p2287_p6), %s2761_s5, 16, %s397_s18, [#allocation13]  }
  0x6d   : > { %s2159_s29 = smov [#allocation15]   ;;  %s2160_s30 = smov [#allocation18]  }
  0x6e   : > { %s420_s22 = sshll.u32 %s2159_s29, 4  ;;  %s442_s15 = sshll.u32 %s2160_s30, 4  ;;  %s421_s22 = int_to_ptr.vmem [resolvable:$true] %s420_s22  ;;  %s443_s15 = int_to_ptr.vmem [resolvable:$true] %s442_s15 }
  0x6f   : > { %s2762_s7 = sld [smem:[#allocation39_spill]] }
  0x75   : > { %s1818_s13 = scalar_lea.hbm %s2762_s7, 16 }
  0x76   : > { %p1819_p1 = scmp.ne.s32.totalorder %s2762_s7, %s1818_s13  ;;  %p1825_p12 = scmp.lt.u32.totalorder %s1818_s13, %s2762_s7 }
  0x78   : > { %p1821_p3 = pnand %p1819_p1, %p2303_p8 }
  0x7a   : > { %p1822_p11 = pneg %p1821_p3 }
  0x7c   : > { %p1827_p13 = pnand %p1825_p12, %p1822_p11 }
  0x7e   : > { %1830 = shalt.err (!%p1827_p13)
}
  0x7f   : > { %s1831_s18 = scalar_lea.vmem %s421_s22, 16  ;;  %s1838_s1 = scalar_lea.vmem %s421_s22, 32 }
  0x80   : > { %p1832_p0 = scmp.ne.s32.totalorder %s421_s22, %s1831_s18  ;;  %p1839_p7 = scmp.lt.s32.totalorder %s421_s22, %s421_s22 }
  0x81   : > { %p1840_p9 = scmp.lt.s32.totalorder %s1838_s1, %s1831_s18 }
  0x82   : > { %p1834_p2 = pnand %p1832_p0, %p2303_p8 }
  0x83   : > { %p1841_p5 = por %p1840_p9, %p1839_p7 }
  0x84   : > { %p1835_p4 = pneg %p1834_p2 }
  0x86   : > { %p1842_p10 = pnand %p1841_p5, %p1835_p4 }
  0x88   : > { %1845 = shalt.err (!%p1842_p10)
}
  0x89   : > { %1614 = dma.hbm_to_vmem [thread:$0]  (!%p2287_p6), %s2762_s7, 16, %s421_s22, [#allocation16]  }
  0x8a   : > { %s1846_s19 = scalar_lea.hbm %s2733_s9, 16 }
  0x8b   : > { %p1847_p1 = scmp.ne.s32.totalorder %s2733_s9, %s1846_s19  ;;  %p1853_p12 = scmp.lt.u32.totalorder %s1846_s19, %s2733_s9 }
  0x8d   : > { %p1849_p3 = pnand %p1847_p1, %p2303_p8 }
  0x8f   : > { %p1850_p11 = pneg %p1849_p3 }
  0x91   : > { %p1855_p13 = pnand %p1853_p12, %p1850_p11 }
  0x93   : > { %1858 = shalt.err (!%p1855_p13)
}
  0x94   : > { %s1859_s18 = scalar_lea.vmem %s443_s15, 16  ;;  %s1866_s22 = scalar_lea.vmem %s443_s15, 32 }
  0x95   : > { %p1860_p0 = scmp.ne.s32.totalorder %s443_s15, %s1859_s18  ;;  %p1867_p7 = scmp.lt.s32.totalorder %s443_s15, %s443_s15 }
  0x96   : > { %p1868_p9 = scmp.lt.s32.totalorder %s1866_s22, %s1859_s18 }
  0x97   : > { %p1862_p2 = pnand %p1860_p0, %p2303_p8 }
  0x98   : > { %p1869_p5 = por %p1868_p9, %p1867_p7 }
  0x99   : > { %p1863_p4 = pneg %p1862_p2 }
  0x9b   : > { %p1870_p10 = pnand %p1869_p5, %p1863_p4 }
  0x9d   : > { %1873 = shalt.err (!%p1870_p10)
}
  0x9e   : > { %1620 = dma.hbm_to_vmem [thread:$0]  (!%p2287_p6), %s2733_s9, 16, %s443_s15, [#allocation19]  }
  0x9f   : > { %s2161_s30 = smov [#allocation11]   ;;  %s2162_s17 = smov [#allocation14]  }
  0xa0   : > { %s385_s20 = sshll.u32 %s2161_s30, 4  ;;  %s406_s19 = sshll.u32 %s2162_s17, 4  ;;  %s386_s20 = int_to_ptr.vmem [resolvable:$true] %s385_s20  ;;  %s407_s19 = int_to_ptr.vmem [resolvable:$true] %s406_s19 }
  0xa1   : > { %s2763_s4 = sld [smem:[#allocation36_spill]] }
  0xa7   : > { %s1874_s16 = scalar_lea.hbm %s2763_s4, 16 }
  0xa8   : > { %p1875_p1 = scmp.ne.s32.totalorder %s2763_s4, %s1874_s16  ;;  %p1881_p12 = scmp.lt.u32.totalorder %s1874_s16, %s2763_s4 }
  0xaa   : > { %p1877_p3 = pnand %p1875_p1, %p2303_p8 }
  0xac   : > { %p1878_p11 = pneg %p1877_p3 }
  0xae   : > { %p1883_p13 = pnand %p1881_p12, %p1878_p11 }
  0xb0   : > { %1886 = shalt.err (!%p1883_p13)
}
  0xb1   : > { %s1887_s15 = scalar_lea.vmem %s386_s20, 16  ;;  %s1894_s29 = scalar_lea.vmem %s386_s20, 32 }
  0xb2   : > { %p1888_p0 = scmp.ne.s32.totalorder %s386_s20, %s1887_s15  ;;  %p1895_p7 = scmp.lt.s32.totalorder %s386_s20, %s386_s20 }
  0xb3   : > { %p1896_p9 = scmp.lt.s32.totalorder %s1894_s29, %s1887_s15 }
  0xb4   : > { %p1890_p2 = pnand %p1888_p0, %p2303_p8 }
  0xb5   : > { %p1897_p5 = por %p1896_p9, %p1895_p7 }
  0xb6   : > { %p1891_p4 = pneg %p1890_p2 }
  0xb8   : > { %p1898_p10 = pnand %p1897_p5, %p1891_p4 }
  0xba   : > { %1901 = shalt.err (!%p1898_p10)
}
  0xbb   : > { %1605 = dma.hbm_to_vmem [thread:$0]  (!%p2287_p6), %s2763_s4, 16, %s386_s20, [#allocation10]  }
  0xbc   : > { %s2764_s6 = sld [smem:[#allocation38_spill]] }
  0xc2   : > { %s1902_s16 = scalar_lea.hbm %s2764_s6, 768 }
  0xc3   : > { %p1903_p1 = scmp.ne.s32.totalorder %s2764_s6, %s1902_s16  ;;  %p1909_p12 = scmp.lt.u32.totalorder %s1902_s16, %s2764_s6 }
  0xc5   : > { %p1905_p3 = pnand %p1903_p1, %p2303_p8 }
  0xc7   : > { %p1906_p11 = pneg %p1905_p3 }
  0xc9   : > { %p1911_p13 = pnand %p1909_p12, %p1906_p11 }
  0xcb   : > { %1914 = shalt.err (!%p1911_p13)
}
  0xcc   : > { %s1915_s15 = scalar_lea.vmem %s407_s19, 768  ;;  %p1923_p7 = scmp.lt.s32.totalorder %s407_s19, %s407_s19 }
  0xcd   : > { %p1916_p0 = scmp.ne.s32.totalorder %s407_s19, %s1915_s15  ;;  %p1924_p9 = scmp.lt.s32.totalorder %s1915_s15, %s1915_s15 }
  0xcf   : > { %p1918_p2 = pnand %p1916_p0, %p2303_p8  ;;  %p1925_p5 = por %p1924_p9, %p1923_p7 }
  0xd1   : > { %p1919_p4 = pneg %p1918_p2 }
  0xd3   : > { %p1926_p10 = pnand %p1925_p5, %p1919_p4 }
  0xd5   : > { %1929 = shalt.err (!%p1926_p10)
}
  0xd6   : > { %s2765_s20 = smov 64   ;;  %s2163_s17 = smov [#allocation17]  }
  0xd7   : > { %1611 = dma.hbm_to_vmem [thread:$0]  (!%p2287_p6), %s2764_s6, 768, %s407_s19, [#allocation13], %s2765_s20, %s2765_s20, %s2158_s21  }
  0xd8   : > { %s431_s13 = sshll.u32 %s2163_s17, 4  ;;  %s2164_s26 = smov [#allocation20]   ;;  %s432_s13 = int_to_ptr.vmem [resolvable:$true] %s431_s13 }
  0xd9   : > { %s453_s16 = sshll.u32 %s2164_s26, 4  ;;  %s1930_s22 = scalar_lea.hbm %s2732_s8, 16  ;;  %s454_s16 = int_to_ptr.vmem [resolvable:$true] %s453_s16 }
  0xda   : > { %p1931_p1 = scmp.ne.s32.totalorder %s2732_s8, %s1930_s22  ;;  %p1937_p12 = scmp.lt.u32.totalorder %s1930_s22, %s2732_s8 }
  0xdc   : > { %p1933_p3 = pnand %p1931_p1, %p2303_p8 }
  0xde   : > { %p1934_p11 = pneg %p1933_p3 }
  0xe0   : > { %p1939_p13 = pnand %p1937_p12, %p1934_p11 }
  0xe2   : > { %1942 = shalt.err (!%p1939_p13)
}
  0xe3   : > { %s1943_s21 = scalar_lea.vmem %s432_s13, 16  ;;  %s1950_s19 = scalar_lea.vmem %s432_s13, 32 }
  0xe4   : > { %p1944_p0 = scmp.ne.s32.totalorder %s432_s13, %s1943_s21  ;;  %p1951_p7 = scmp.lt.s32.totalorder %s432_s13, %s432_s13 }
  0xe5   : > { %p1952_p9 = scmp.lt.s32.totalorder %s1950_s19, %s1943_s21 }
  0xe6   : > { %p1946_p2 = pnand %p1944_p0, %p2303_p8 }
  0xe7   : > { %p1953_p5 = por %p1952_p9, %p1951_p7 }
  0xe8   : > { %p1947_p4 = pneg %p1946_p2 }
  0xea   : > { %p1954_p10 = pnand %p1953_p5, %p1947_p4 }
  0xec   : > { %1957 = shalt.err (!%p1954_p10)
}
  0xed   : > { %1617 = dma.hbm_to_vmem [thread:$0]  (!%p2287_p6), %s2732_s8, 16, %s432_s13, [#allocation16]  }
  0xee   : > { %s1958_s26 = scalar_lea.hbm %s2734_s10, 16 }
  0xef   : > { %p1959_p1 = scmp.ne.s32.totalorder %s2734_s10, %s1958_s26  ;;  %p1965_p12 = scmp.lt.u32.totalorder %s1958_s26, %s2734_s10 }
  0xf1   : > { %p1961_p3 = pnand %p1959_p1, %p2303_p8 }
  0xf3   : > { %p1962_p11 = pneg %p1961_p3 }
  0xf5   : > { %p1967_p13 = pnand %p1965_p12, %p1962_p11 }
  0xf7   : > { %1970 = shalt.err (!%p1967_p13)
}
  0xf8   : > { %s1971_s15 = scalar_lea.vmem %s454_s16, 16  ;;  %s1978_s13 = scalar_lea.vmem %s454_s16, 32 }
  0xf9   : > { %p1972_p0 = scmp.ne.s32.totalorder %s454_s16, %s1971_s15  ;;  %p1979_p7 = scmp.lt.s32.totalorder %s454_s16, %s454_s16 }
  0xfa   : > { %p1980_p9 = scmp.lt.s32.totalorder %s1978_s13, %s1971_s15 }
  0xfb   : > { %p1974_p2 = pnand %p1972_p0, %p2303_p8 }
  0xfc   : > { %p1981_p5 = por %p1980_p9, %p1979_p7 }
  0xfd   : > { %p1975_p4 = pneg %p1974_p2 }
  0xff   : > { %p1982_p10 = pnand %p1981_p5, %p1975_p4 }
 0x101   : > { %1985 = shalt.err (!%p1982_p10)
}
 0x102   : > { %1623 = dma.hbm_to_vmem [thread:$0]  (!%p2287_p6), %s2734_s10, 16, %s454_s16, [#allocation19]  }
 0x103   : > { %s1422_s12 = sadd.s32 4294967294, %s2152_s27   ;;  %s49_s19 = sadd.s32 1, %s2148_s11 }
 0x104   : > { %s58_s14 = sadd.s32 1, %s2140_s25  ;;  %p51_p8 = scmp.ge.s32.totalorder %s49_s19, 2 }
 0x105   : > { %p65_p1 = scmp.ne.s32.totalorder %s2140_s25, %s2136_s24  ;;  %p66_p3 = scmp.eq.s32.totalorder %s2152_s27, 0 }
 0x106   : > { %p71_p11 = scmp.ne.s32.totalorder %s2136_s24, %s2132_s23  ;;  %s2798_s19 = smov (%p51_p8, %s49_s19), 0 }
 0x107   : > { %p2491_p12 = por %p66_p3, %p65_p1  ;;  %p2767_p13 = scmp.eq.s32.totalorder %s2271_s28, 0 }
 0x108   : > { %s53_s30 = ssub.s32 %s2148_s11, %s2798_s19  ;;  %p335_p0 = scmp.eq.s32.totalorder %s2271_s28, 1 }
 0x109   : > { %p2497_p6 = por %p2767_p13, %p71_p11  ;;  %p56_p2 = scmp.eq.s32.totalorder %s53_s30, 0 }
 0x10a   : > { %p341_p4 = scmp.eq.s32.totalorder %s1422_s12, 1  ;;  %p2504_p7 = por %p335_p0, %p65_p1 }
 0x10b   : > { %p1644_p9 = scmp.lt.s32.totalorder %s2152_s27, 2  ;;  %s2517_s0 = sand.u32 1, %s2140_s25  }
 0x10c   : > { %s2769_s2 = scalar_select %p2504_p7, 1, 0 }
 0x10d   : > { %s2510_s17 = scalar_select %p56_p2, %s2140_s25, %s58_s14  }
 0x10e   : > { %p2512_p5 = por %p341_p4, %p71_p11  ;;  %s1434_s18 = sshll.u32 %s2517_s0, 3 }
 0x10f   : > { %s1435_s22 = sshll.u32 %s2148_s11, 7  ;;  %s2771_s13 = sld [smem:[#allocation32_spill]] }
 0x110   : > { %s2770_s26 = scalar_select %p2512_p5, 1, 0 }
 0x111   : > { %s471_s21 = scalar_lea.vmem [#allocation3], %s1434_s18  ;;  %p2530_p10 = pnand %p1644_p9, %p2491_p12 }
 0x112   : > { %s479_s12 = sshll.u32 %s471_s21, 4  ;;  %s1436_s30 = sshll.u32 %s2517_s0, 4  ;;  %s2526_s12 = int_to_ptr.vmem [resolvable:$true] %s479_s12 }
 0x113   : > { %s468_s1 = scalar_lea.sflag [#allocation4], %s2517_s0  ;;  %p1988_p1 = pneg %p2530_p10 }
 0x115   : > { %s2524_s29 = scalar_lea.hbm %s2771_s13, %s1435_s22  ;;  %s1991_s20 = scalar_lea.hbm %s2771_s13, 256 }
 0x116   : > { %s1986_s22 = scalar_lea.hbm %s2524_s29, 128  ;;  %p1992_p12 = scmp.lt.u32.totalorder %s2524_s29, %s2771_s13 }
 0x117   : > { %p1987_p8 = scmp.ne.s32.totalorder %s2524_s29, %s1986_s22  ;;  %p1993_p13 = scmp.lt.u32.totalorder %s1991_s20, %s1986_s22 }
 0x118   : > { %p1995_p2 = scmp.lt.u32.totalorder %s1986_s22, %s2524_s29 }
 0x119   : > { %p1989_p3 = pnand %p1988_p1, %p1987_p8  ;;  %p1994_p0 = por %p1993_p13, %p1992_p12 }
 0x11b   : > { %p1990_p11 = pneg %p1989_p3  ;;  %p1996_p4 = por %p1995_p2, %p1994_p0 }
 0x11d   : > { %p1997_p9 = pnand %p1996_p4, %p1990_p11 }
 0x11f   : > { %2000 = shalt.err (!%p1997_p9)
}
 0x120   : > { %s2001_s3 = scalar_lea.vmem %s2526_s12, 128  ;;  %s2165_s18 = smov [#allocation3]  }
 0x121   : > { %p2002_p8 = scmp.ne.s32.totalorder %s2526_s12, %s2001_s3  ;;  %s2006_s15 = sshll.u32 %s2165_s18, 4  ;;  %s2007_s15 = int_to_ptr.vmem [resolvable:$false] %s2006_s15 }
 0x122   : > { %s2008_s4 = scalar_lea.vmem %s2007_s15, 256  ;;  %p2009_p7 = scmp.lt.s32.totalorder %s2526_s12, %s2007_s15 }
 0x123   : > { %p2004_p3 = pnand %p2002_p8, %p1988_p1  ;;  %p2010_p12 = scmp.lt.s32.totalorder %s2008_s4, %s2001_s3 }
 0x125   : > { %p2005_p5 = pneg %p2004_p3  ;;  %p2011_p13 = por %p2010_p12, %p2009_p7 }
 0x127   : > { %p2012_p0 = pnand %p2011_p13, %p2005_p5 }
 0x129   : > { %2015 = shalt.err (!%p2012_p0)
}
 0x12a   : > { %1627 = dma.hbm_to_vmem [thread:$0]  (!%p2530_p10), %s2524_s29, 128, %s2526_s12, %s468_s1  }
 0x12b   : > { %s490_s22 = scalar_lea.vmem [#allocation6], %s1436_s30  ;;  %s486_s21 = sand.u32 1, %s2152_s27  }
 0x12c   : > { %s499_s20 = sshll.u32 %s490_s22, 4  ;;  %s2773_s18 = sshll.u32 %s2148_s11, 8  ;;  %s2565_s20 = int_to_ptr.vmem [resolvable:$true] %s499_s20 }
 0x12d   : > { %s2774_s4 = sld [smem:[#allocation33_spill]]  ;;  %s2574_s6 = scalar_lea.sflag [#allocation7], %s486_s21 }
 0x133   : > { %s2572_s5 = scalar_lea.hbm %s2774_s4, %s2773_s18  ;;  %s2021_s12 = scalar_lea.hbm %s2774_s4, 512 }
 0x134   : > { %s2016_s7 = scalar_lea.hbm %s2572_s5, 256  ;;  %p2022_p2 = scmp.lt.u32.totalorder %s2572_s5, %s2774_s4 }
 0x135   : > { %p2017_p7 = scmp.ne.s32.totalorder %s2572_s5, %s2016_s7  ;;  %p2023_p4 = scmp.lt.u32.totalorder %s2021_s12, %s2016_s7 }
 0x136   : > { %p2025_p8 = scmp.lt.u32.totalorder %s2016_s7, %s2572_s5 }
 0x137   : > { %p2019_p5 = pnand %p2017_p7, %p1988_p1  ;;  %p2024_p9 = por %p2023_p4, %p2022_p2 }
 0x139   : > { %p2020_p11 = pneg %p2019_p5  ;;  %p2026_p3 = por %p2025_p8, %p2024_p9 }
 0x13b   : > { %p2027_p12 = pnand %p2026_p3, %p2020_p11 }
 0x13d   : > { %2030 = shalt.err (!%p2027_p12)
}
 0x13e   : > { %s2031_s22 = scalar_lea.vmem %s2565_s20, 256  ;;  %s2166_s21 = smov [#allocation6]  }
 0x13f   : > { %p2032_p13 = scmp.ne.s32.totalorder %s2565_s20, %s2031_s22  ;;  %s2036_s18 = sshll.u32 %s2166_s21, 4  ;;  %s2037_s18 = int_to_ptr.vmem [resolvable:$false] %s2036_s18 }
 0x140   : > { %s2038_s3 = scalar_lea.vmem %s2037_s18, 512  ;;  %p2039_p5 = scmp.lt.s32.totalorder %s2565_s20, %s2037_s18 }
 0x141   : > { %p2034_p0 = pnand %p2032_p13, %p1988_p1  ;;  %p2040_p2 = scmp.lt.s32.totalorder %s2038_s3, %s2031_s22 }
 0x143   : > { %p2035_p7 = pneg %p2034_p0  ;;  %p2041_p4 = por %p2040_p2, %p2039_p5 }
 0x145   : > { %p2042_p9 = pnand %p2041_p4, %p2035_p7 }
 0x147   : > { %2045 = shalt.err (!%p2042_p9)
}
 0x148   : > { %s2167_s7 = smov 128   ;;  %s2168_s15 = smov 8  }
 0x149   : > { %1630 = dma.hbm_to_vmem [thread:$0]  (!%p2530_p10), %s2572_s5, 256, %s2565_s20, %s2574_s6, %s2167_s7, %s2167_s7, %s2168_s15  }
 0x14a   : > { %s2775_s0 = sld [smem:[#allocation31_spill]] }
 0x150   : > { %p2776_p1 = scmp.ne.s32.totalorder %s2775_s0, 0 }
 0x151   : > { %s2603_s29 = sand.u32 (!%p2776_p1), 1, %s2136_s24  }
 0x152   : > { %511 = sbr.rel (%p2776_p1) target bundleno = 1350 (0x546), region = 68  ;;  %s1440_s12 = sshll.u32 (!%p2776_p1), %s2603_s29, 3 }
 0x153   : > { %s514_s30 = scalar_lea.sflag (!%p2776_p1), [#allocation4], %s2603_s29  ;;  %s517_s1 = scalar_lea.vmem (!%p2776_p1), [#allocation3], %s1440_s12 }
 0x159   : > { %2099 = dma.done.wait (%p2497_p6), %s514_s30, 128  }
 0x15a   : > { %2101 = vsyncadd (%p2497_p6), %s514_s30, 4294967168  ;;  %s522_s5 = sand.u32 1, %s2271_s28  }
 0x15b   : > { %s523_s6 = scalar_lea.sflag [#allocation7], %s522_s5 }
 0x15c   : > { %2103 = dma.done.wait (%p2497_p6), %s523_s6, 256  }
 0x15d   : > { %2105 = vsyncadd (%p2497_p6), %s523_s6, 4294967040  ;;  %p2777_p10 = scmp.eq.s32.totalorder %s2271_s28, 0 }
 0x15f   : > { %2107 = dma.done.wait (%p2777_p10), [#allocation7], 768   ;;  %p2778_p11 = pmov %p2777_p10 }
 0x160   : > { %p2779_p8 = pmov %p2777_p10 }
 0x161   : > { %2109 = vsyncadd (%p2778_p11), [#allocation7], 4294966528 }
 0x162   : > { %2111 = dma.done.wait (%p2779_p8), [#allocation10], 32   ;;  %p2780_p3 = pmov %p2779_p8 }
 0x164   : > { %2113 = vsyncadd (%p2780_p3), [#allocation10], 4294967264  ;;  %p2781_p12 = pmov %p2780_p3 }
 0x165   : > { %p2782_p13 = pmov %p2780_p3 }
 0x166   : > { %2115 = dma.done.wait (%p2781_p12), [#allocation13], 784  }
 0x167   : > { %2117 = vsyncadd (%p2782_p13), [#allocation13], 4294966512  ;;  %p2783_p6 = pmov %p2780_p3 }
 0x168   : > { %p2784_p0 = pmov %p2780_p3 }
 0x169   : > { %2119 = dma.done.wait (%p2783_p6), [#allocation16], 32  }
 0x16a   : > { %2121 = vsyncadd (%p2784_p0), [#allocation16], 4294967264  ;;  %p2785_p7 = pmov %p2784_p0 }
 0x16b   : > { %p2786_p5 = pmov %p2784_p0 }
 0x16c   : > { %2123 = dma.done.wait (%p2785_p7), [#allocation19], 32  }
 0x16d   : > { %2125 = vsyncadd (%p2786_p5), [#allocation19], 4294967264  ;;  %v1718_v1 = vld [vmem:[#allocation8] sm:$0xff]   ;;  %v1719_v2 = vld [vmem:[#allocation8 + $0x10] sm:$0xff]   ;;  %vm657_vm0 = vcmask 261120   ;;  %v2169_v5 = vmov 0.0   ;;  %v610_v11 = vlaneseq }
 0x16e   : > { %1504 = vmatprep.subr.bf16.mxu0 %v1718_v1  ;;  %v1720_v3 = vld [vmem:[#allocation8 + $0x8] sm:$0xff]   ;;  %1512 = vmatprep.subr.bf16.mxu1 %v1719_v2  ;;  %v628_v4 = vld [vmem:[%s517_s1] sm:$0xff]  ;;  %v1722_v8 = vld [vmem:[#allocation8 + $0x20] sm:$0xff]   ;;  %v2170_v10 = vmov 0.0|0.0   ;;  %s2787_s28 = sld [smem:[#allocation30_spill]]  ;;  %s606_s20 = scalar_lea.vmem [#allocation21], %s2603_s29 }
 0x16f   : > { %1505 = vmatpush3.bf16.msra.mxu0 %v1718_v1  ;;  %1513 = vmatpush3.bf16.msra.mxu1 %v1719_v2  ;;  %v639_v6 = vpack.c.bf16 %v628_v4, %v2169_v5  ;;  %v1721_v7 = vld [vmem:[#allocation8 + $0x18] sm:$0xff]   ;;  %v1723_v9 = vld [vmem:[#allocation8 + $0x28] sm:$0xff]   ;;  %v2644_v12 = vshrl.u32 %v610_v11, 7  ;;  %v1460_v32 = vld [vmem:[#allocation9] ss:$0 sm:$0xff]  ;;  %s1234_s22 = sshll.u32 %s606_s20, 4  ;;  %s2677_s22 = int_to_ptr.vmem [resolvable:$true] %s1234_s22 }
 0x170   : > { %1506 = vmatprep.subr.bf16.mxu0 %v1720_v3  ;;  %1514 = vmatprep.subr.bf16.mxu1 %v1721_v7  ;;  %v1724_v39 = vld [vmem:[#allocation14] sm:$0xff]   ;;  %v1725_v40 = vld [vmem:[#allocation14 + $0x10] sm:$0xff]   ;;  %v1726_v41 = vld [vmem:[#allocation14 + $0x8] sm:$0xff]   ;;  %vm1218_vm3 = vcmask 57344   ;;  %s2788_s3 = sld [smem:[#allocation40_spill]]  ;;  %s1221_s15 = scalar_lea.sflag [#allocation5], %s2603_s29 }
 0x171   : > { %1508 = vmatprep.mubr.msk.bf16.mxu0 %vm657_vm0, %v639_v6  ;;  %1516 = vmatprep.mubr.msk.bf16.mxu1 %vm657_vm0, %v639_v6  ;;  %vm845_vm1 = vcmp.lt.s32.totalorder %v2644_v12, 1  ;;  %vm855_vm2 = vcmp.lt.s32.totalorder %v2644_v12, 7  ;;  %v1727_v42 = vld [vmem:[#allocation14 + $0x18] sm:$0xff]   ;;  %v1728_v43 = vld [vmem:[#allocation14 + $0x20] sm:$0xff]   ;;  %v1729_v60 = vld [vmem:[#allocation14 + $0x28] sm:$0xff]   ;;  %s2046_s0 = scalar_lea.vmem %s2677_s22, 16 }
 0x172   : > { %v1461_v54 = vld [vmem:[#allocation11] ss:$0 sm:$0xff]  ;;  %v1462_v56 = vld [vmem:[#allocation12] ss:$0 sm:$0xff]  ;;  %p2047_p2 = scmp.ne.s32.totalorder %s2677_s22, %s2046_s0  ;;  %p2789_p4 = scmp.ne.s32.totalorder %s2769_s2, 0 }
 0x173   : > { %1507 = vmatpush3.bf16.msra.mxu0 %v1720_v3  ;;  %1515 = vmatpush3.bf16.msra.mxu1 %v1721_v7  ;;  %s2171_s12 = smov [#allocation21]  }
 0x174   : > { %1520 = vmatprep.subr.bf16.mxu0 %v1722_v8  ;;  %1528 = vmatprep.subr.bf16.mxu1 %v1724_v39  ;;  %s1476_s14 = sshll.u32 %s2787_s28, 4  ;;  %p2048_p9 = pnand %p2047_p2, %p2789_p4 }
 0x175   : > { %s2050_s30 = sshll.u32 %s2171_s12, 4  ;;  %s2051_s30 = int_to_ptr.vmem [resolvable:$false] %s2050_s30 }
 0x176   : > { %1509 = vmatmul.mubr.bf16.vlgmr.msra.gmra.mrb[0].mxu0 %v2170_v10  ;;  %1517 = vmatmul.mubr.bf16.vlgmr.msra.gmra.mrb[0].mxu1 %v2170_v10  ;;  %s2675_s7 = scalar_lea.hbm %s2788_s3, %s1476_s14  ;;  %p2049_p1 = pneg %p2048_p9 }
 0x177   : > { %1521 = vmatpush3.bf16.msra.mxu0 %v1722_v8  ;;  %1524 = vmatprep.mubr.msk.bf16.mxu0 %vm657_vm0, %v639_v6  ;;  %s2052_s1 = scalar_lea.vmem %s2051_s30, 32  ;;  %p2053_p10 = scmp.lt.s32.totalorder %s2677_s22, %s2051_s30 }
 0x178   : > { %1522 = vmatprep.subr.bf16.mxu0 %v1723_v9  ;;  %1529 = vmatpush3.bf16.msra.mxu1 %v1724_v39  ;;  %p2054_p11 = scmp.lt.s32.totalorder %s2052_s1, %s2046_s0 }
 0x179   : > { %1530 = vmatprep.subr.bf16.mxu1 %v1726_v41 }
 0x17a   : > { %p2055_p8 = por %p2054_p11, %p2053_p10 }
 0x17b   : > { %1523 = vmatpush3.bf16.msra.mxu0 %v1723_v9 }
 0x17c   : > { %1536 = vmatprep.subr.bf16.mxu0 %v1725_v40  ;;  %1531 = vmatpush3.bf16.msra.mxu1 %v1726_v41  ;;  %p2056_p3 = pnand %p2055_p8, %p2049_p1 }
 0x17d   : > { %1544 = vmatprep.subr.bf16.mxu1 %v1728_v43 }
 0x17e   : > { %1525 = vmatmul.mubr.bf16.vlgmr.msra.gmra.mrb[4].mxu0 %v2170_v10 }
 0x17f   : > { %1537 = vmatpush3.bf16.msra.mxu0 %v1725_v40  ;;  %v1475_v40 = vld [vmem:[#allocation20] ss:$0 sm:$0xff] }
 0x180   : > { %1538 = vmatprep.subr.bf16.mxu0 %v1727_v42 }
 0x183   : > { %1539 = vmatpush3.bf16.msra.mxu0 %v1727_v42 }
 0x249   : > { %v1510_v13 = vpop.f32.mrb[0].mxu0  ;;  %v1518_v15 = vpop.f32.mrb[0].mxu1 }
 0x24a   : > { %v698_v14 = vpop.f32.mrb[1].mxu0  ;;  %v763_v17 = vpop.f32.mrb[1].mxu1 }
 0x24b   : > { %v1511_v16 = vpop.f32.mrb[2].mxu0  ;;  %v1519_v19 = vpop.f32.mrb[2].mxu1  ;;  %v842_v20 = vrot.slane %v698_v14, 7 }
 0x24c   : > { %v701_v18 = vpop.f32.mrb[3].mxu0  ;;  %v766_v22 = vpop.f32.mrb[3].mxu1 }
 0x24d   : > { %v843_v21 = vrot.slane %v701_v18, 7  ;;  %v1472_v18 = vld [vmem:[#allocation15] ss:$0 sm:$0xff] }
 0x24f   : > { %v847_v23 = vsel %vm845_vm1, %v842_v20, %v843_v21 }
 0x250   : > { %v850_v24 = vadd.f32 %v847_v23, %v766_v22 }
 0x251   : > { %v1526_v25 = vpop.f32.mrb[4].mxu0 }
 0x252   : > { %v828_v26 = vpop.f32.mrb[5].mxu0  ;;  %v854_v29 = vrot.slane %v1526_v25, 1  ;;  %v1205_v25 = vld [vmem:[#allocation2] sm:$0x1] }
 0x253   : > { %v1527_v27 = vpop.f32.mrb[6].mxu0  ;;  %1552 = vpush %v1205_v25 }
 0x254   : > { %v831_v28 = vpop.f32.mrb[7].mxu0 }
 0x255   : > { %v853_v30 = vrot.slane %v831_v28, 1 }
 0x257   : > { %v856_v31 = vsel %vm855_vm2, %v853_v30, %v854_v29 }
 0x258   : > { %v860_v33 = vadd.f32 %v856_v31, %v850_v24 }
 0x25a   : > { %v870_v34 = vadd.f32 %v1460_v32, %v860_v33 }
 0x25c   : > { %v873_v35 = vmax.f32 %v870_v34, 0.0 }
 0x25e   : > { %v880_v36 = vsel %vm657_vm0, %v873_v35, 0.0  ;;  %v891_v37 = vmul.f32 %v873_v35, %v873_v35 }
 0x25f   : > { %881 = vadd.xlane.f32.xlu0 %v880_v36  ;;  %v1473_v36 = vld [vmem:[#allocation17] ss:$0 sm:$0xff] }
 0x260   : > { %v896_v38 = vsel %vm657_vm0, %v891_v37, 0.0 }
 0x263   : > { %897 = vadd.xlane.f32.xlu0 %v896_v38  ;;  %v1474_v38 = vld [vmem:[#allocation18] ss:$0 sm:$0xff] }
 0x284   : > { %s1553_s16 = spop %1552 }
 0x2ec   : > { %v882_v44 = vpop.xlane.xlu0 %881 }
 0x2ed   : > { %v888_v45 = vmul.f32 0.03125, %v882_v44  ;;  %v1212_v44 = vand.u32 127, %v610_v11 }
 0x2ef   : > { %v906_v47 = vmul.f32 %v888_v45, %v888_v45  ;;  %v915_v52 = vsub.f32 %v873_v35, %v888_v45  ;;  %v1207_v45 = vstv %s1553_s16 }
 0x2f0   : > { %v898_v46 = vpop.xlane.xlu0 %897 }
 0x2f1   : > { %v903_v48 = vmul.f32 0.03125, %v898_v46 }
 0x2f3   : > { %v909_v49 = vsub.f32 %v903_v48, %v906_v47  ;;  %v1215_v47 = vsub.s32 %v1212_v44, %v2644_v12 }
 0x2f5   : > { %v912_v50 = vmax.f32 %v909_v49, 0.0 }
 0x2f7   : > { %v918_v51 = vadd.f32 1e-05, %v912_v50 }
 0x2f9   : > { %1730 = vrsqrt.f32 %v918_v51 }
 0x303   : > { %v1731_v53 = vpop.eup %1730 }
 0x304   : > { %v924_v55 = vmul.f32 %v1731_v53, %v915_v52 }
 0x306   : > { %v933_v57 = vmul.f32 %v1461_v54, %v924_v55 }
 0x308   : > { %v942_v58 = vadd.f32 %v1462_v56, %v933_v57 }
 0x30a   : > { %v947_v59 = vpack.c.bf16 %v942_v58, %v2169_v5 }
 0x30c   : > { %1532 = vmatprep.mubr.msk.bf16.mxu1 %vm657_vm0, %v947_v59  ;;  %1540 = vmatprep.mubr.msk.bf16.mxu0 %vm657_vm0, %v947_v59 }
 0x30d   : > { %1533 = vmatmul.mubr.bf16.vlgmr.msra.gmra.mrb[4].mxu1 %v2170_v10  ;;  %1541 = vmatmul.mubr.bf16.vlgmr.msra.gmra.mrb[8].mxu0 %v2170_v10 }
 0x30e   : > { %1545 = vmatpush3.bf16.msra.mxu1 %v1728_v43  ;;  %1548 = vmatprep.mubr.msk.bf16.mxu1 %vm657_vm0, %v947_v59 }
 0x30f   : > { %1546 = vmatprep.subr.bf16.mxu1 %v1729_v60 }
 0x312   : > { %1547 = vmatpush3.bf16.msra.mxu1 %v1729_v60 }
 0x315   : > { %1549 = vmatmul.mubr.bf16.vlgmr.msra.gmra.mrb[8].mxu1 %v2170_v10 }
 0x3e0   : > { %v1534_v61 = vpop.f32.mrb[4].mxu1  ;;  %v1542_v62 = vpop.f32.mrb[8].mxu0 }
 0x3e1   : > { %v1005_v63 = vpop.f32.mrb[5].mxu1  ;;  %v1069_v0 = vpop.f32.mrb[9].mxu0 }
 0x3e2   : > { %v1535_v1 = vpop.f32.mrb[6].mxu1  ;;  %v1543_v2 = vpop.f32.mrb[10].mxu0  ;;  %v1145_v5 = vrot.slane %v1005_v63, 7 }
 0x3e3   : > { %v1008_v3 = vpop.f32.mrb[7].mxu1  ;;  %v1071_v4 = vpop.f32.mrb[11].mxu0 }
 0x3e4   : > { %v1146_v6 = vrot.slane %v1008_v3, 7 }
 0x3e6   : > { %v1147_v7 = vsel %vm845_vm1, %v1145_v5, %v1146_v6 }
 0x3e7   : > { %v1148_v8 = vadd.f32 %v1147_v7, %v1071_v4 }
 0x3e8   : > { %v1550_v9 = vpop.f32.mrb[8].mxu1 }
 0x3e9   : > { %v1132_v13 = vpop.f32.mrb[9].mxu1  ;;  %v1150_v16 = vrot.slane %v1550_v9, 1 }
 0x3ea   : > { %v1551_v14 = vpop.f32.mrb[10].mxu1 }
 0x3eb   : > { %v1134_v15 = vpop.f32.mrb[11].mxu1 }
 0x3ec   : > { %v1149_v10 = vrot.slane %v1134_v15, 1 }
 0x3ee   : > { %v1151_v17 = vsel %vm855_vm2, %v1149_v10, %v1150_v16 }
 0x3ef   : > { %v1152_v19 = vadd.f32 %v1151_v17, %v1148_v8 }
 0x3f1   : > { %v1160_v20 = vadd.f32 %v1472_v18, %v1152_v19 }
 0x3f3   : > { %v1161_v21 = vmax.f32 %v1160_v20, 0.0 }
 0x3f5   : > { %v1164_v22 = vsel %vm657_vm0, %v1161_v21, 0.0  ;;  %v1168_v23 = vmul.f32 %v1161_v21, %v1161_v21 }
 0x3f6   : > { %1165 = vadd.xlane.f32.xlu1 %v1164_v22 }
 0x3f7   : > { %v1169_v24 = vsel %vm657_vm0, %v1168_v23, 0.0 }
 0x3fa   : > { %1170 = vadd.xlane.f32.xlu1 %v1169_v24 }
 0x483   : > { %v1166_v26 = vpop.xlane.xlu1 %1165 }
 0x484   : > { %v1167_v27 = vmul.f32 0.03125, %v1166_v26 }
 0x486   : > { %v1173_v29 = vmul.f32 %v1167_v27, %v1167_v27  ;;  %v1176_v34 = vsub.f32 %v1161_v21, %v1167_v27 }
 0x487   : > { %v1171_v28 = vpop.xlane.xlu1 %1170 }
 0x488   : > { %v1172_v30 = vmul.f32 0.03125, %v1171_v28 }
 0x48a   : > { %v1174_v31 = vsub.f32 %v1172_v30, %v1173_v29 }
 0x48c   : > { %v1175_v32 = vmax.f32 %v1174_v31, 0.0 }
 0x48e   : > { %v1177_v33 = vadd.f32 1e-05, %v1175_v32 }
 0x490   : > { %1732 = vrsqrt.f32 %v1177_v33 }
 0x49a   : > { %v1733_v35 = vpop.eup %1732 }
 0x49b   : > { %v1179_v37 = vmul.f32 %v1733_v35, %v1176_v34 }
 0x49d   : > { %v1186_v39 = vmul.f32 %v1473_v36, %v1179_v37 }
 0x49f   : > { %v1193_v41 = vadd.f32 %v1474_v38, %v1186_v39 }
 0x4a1   : > { %v1201_v42 = vmul.f32 %v1475_v40, %v1193_v41 }
 0x4a3   : > { %v1202_v43 = vsel %vm657_vm0, %v1201_v42, 0.0 }
 0x4a4   : > { %1203 = vadd.xlane.f32.xlu0 %v1202_v43 }
 0x531   : > { %v1204_v46 = vpop.xlane.xlu0 %1203 }
 0x532   : > { %v1208_v48 = vadd.f32 %v1207_v45, %v1204_v46 }
 0x534   : > { %v1209_v49 = vmax.f32 %v1208_v48, 0.0 }
 0x536   : > { %v1216_v50 = vrot.slane %v1209_v49, %v1215_v47 }
 0x538   : > { %1219 = vst.msk [vmem:[%s606_s20] sm:$0x1] %vm1218_vm3, %v1216_v50 }
 0x539   : > { %2059 = shalt.err (!%p2056_p3)
}
 0x53a   : > { %s2060_s29 = scalar_lea.hbm %s2675_s7, 16  ;;  %s2064_s28 = scalar_lea.hbm %s2788_s3, 32 }
 0x53b   : > { %p2061_p12 = scmp.ne.s32.totalorder %s2675_s7, %s2060_s29  ;;  %p2065_p0 = scmp.lt.u32.totalorder %s2675_s7, %s2788_s3 }
 0x53c   : > { %p2066_p7 = scmp.lt.u32.totalorder %s2064_s28, %s2060_s29  ;;  %p2068_p2 = scmp.lt.u32.totalorder %s2060_s29, %s2675_s7 }
 0x53d   : > { %p2062_p13 = pnand %p2061_p12, %p2789_p4 }
 0x53e   : > { %p2067_p5 = por %p2066_p7, %p2065_p0 }
 0x53f   : > { %p2063_p6 = pneg %p2062_p13 }
 0x540   : > { %p2069_p9 = por %p2068_p2, %p2067_p5 }
 0x542   : > { %p2070_p1 = pnand %p2069_p9, %p2063_p6 }
 0x544   : > { %2073 = shalt.err (!%p2070_p1)
}
 0x545   : > { %1594 = dma.vmem_to_hbm [thread:$0]  (%p2789_p4), %s2677_s22, 16, %s2675_s7, %s1221_s15  }
 0x546 PF: > { %s1246_s20 = sand.u32 1, %s2132_s23   ;;  %p2790_p10 = scmp.ne.s32.totalorder %s2770_s26, 0 }
 0x547   : > { %p2791_p11 = scmp.ge.s32.totalorder %s2152_s27, 2  ;;  %s1247_s21 = scalar_lea.sflag [#allocation5], %s1246_s20 }
 0x549   : > { %p1632_p8 = pnand %p2791_p11, %p2790_p10 }
 0x54b   : > { %2127 = dma.done.wait (!%p1632_p8), %s1247_s21, 16  }
 0x54c   : > { %2129 = vsyncadd (!%p1632_p8), %s1247_s21, 4294967280  ;;  %s37_s27 = sadd.s32 1, %s2152_s27   ;;  %s2792_s23 = smov %s2136_s24 }
 0x54d   : > { %p34_p3 = scmp.ge.s32.totalorder %s37_s27, 4   ;;  %s2793_s24 = smov %s2140_s25 }
 0x54e   : > { %s2794_s25 = smov %s2510_s17  ;;  %s2795_s26 = smov %s2148_s11 }
 0x54f   : > { %s2796_s11 = smov %s2798_s19  ;;  %36 = sbr.rel (!%p34_p3) target bundleno = 22 (0x16), region = 166 }
 0x556   :  { %1251 = vsyncpa [#allocation4], 1 }
 0x557   :  { %1253 = vsyncpa [#allocation4 + $0x1], 1 }
 0x558   :  { %1254 = vsyncpa [#allocation7], 1 }
 0x559   :  { %1256 = vsyncpa [#allocation7 + $0x1], 1 }
 0x55a   :  { %1257 = vsyncpa [#allocation10], 1 }
 0x55b   :  { %1258 = vsyncpa [#allocation13], 1 }
 0x55c   :  { %1259 = vsyncpa [#allocation16], 1 }
 0x55d   :  { %1260 = vsyncpa [#allocation19], 1 }
 0x55e   :  { %1261 = vsyncpa [#allocation5], 1 }
 0x55f   :  { %1263 = vsyncpa [#allocation5 + $0x1], 1 }

</bundles_post_ra>
